<compile_context>
chip_gen: v6e
topology: v6e:2x2x1
jax: 0.10.0
libtpu: 0.0.40
codegen_flags: <defaults>
</compile_context>

<pallas_src>
import jax
import jax.numpy as jnp
from jax.experimental import pallas as pl
from jax.experimental.pallas import tpu as pltpu


IN_DIM = 100   # projection_in input features
HID_DIM = 64   # projection_in output features
OUT_DIM = 10   # projection_out (unused in forward)


def _projection_kernel(x_ref, w_ref, b_ref, o_ref):
    # x_ref: (tr, Cin)   caller dtype -> cast to bf16 on-VPU (free under HBM bound)
    # w_ref: (Cin, Cout) bf16, VMEM-resident across all batch tiles
    # b_ref: (1, Cout)   f32,  VMEM-resident
    # o_ref: (tr, Cout)  bf16 by default
    # MXU matmul accumulates in f32; bias add + sigmoid run in f32 on VPU/EUP.
    x = x_ref[...].astype(jnp.bfloat16)
    y = jnp.dot(x, w_ref[...], preferred_element_type=jnp.float32)
    y = y + b_ref[...]
    o_ref[...] = jax.nn.sigmoid(y).astype(o_ref.dtype)


def _round_up(x, m):
    return ((x + m - 1) // m) * m


def _choose_row_tile(rows, max_rows):
    """Row tile: a multiple of 8 (sublanes) unless it covers the whole array,
    and small enough that the grid has >=2 steps when `rows` allows, so v7x can
    shard the 'parallel' batch axis across both TensorCores."""
    max_rows = max(8, (max_rows // 8) * 8)
    if rows <= max_rows:
        half = _round_up(pl.cdiv(rows, 2), 8)
        return rows if half >= rows else half
    return max_rows


def projection_forward(x, params, *, block_b=8192, out_dtype=jnp.bfloat16):
    """sigmoid(x @ W^T + b), matching torch.sigmoid(Linear(100, 64)(x)).

    x:       (B, 100) any float dtype -- streamed as-is, cast to bf16 in-kernel.
    params:  dict from prepare_params() (bf16 weights, f32 bias, paired variants).
    block_b: max x rows consumed per grid step.  Default (8192) keeps the
             double-buffered footprint ~9 MiB -- inside every generation's
             scoped-VMEM default; raise vmem_limit_bytes below if you raise it a lot.
    Returns (B, 64) in out_dtype (bf16 by default; pass jnp.float32 if needed).
    Accepted precision contract vs. the f32 reference: atol/rtol ~2e-2.
    """
    B, in_dim = x.shape
    assert in_dim == IN_DIM, f"expected (B, {IN_DIM}) input, got {x.shape}"

    paired = (B % 2 == 0)
    if paired:
        # Lane-dense path: fold row pairs into the lane dim (free row-major
        # reshape of a contiguous array) and use the block-diagonal weight so
        # the output slab is 128 lanes wide (unmasked stores, dense writeback).
        x_k = x.reshape(B // 2, 2 * IN_DIM)
        w_k = params["w_pair"]            # (200, 128) bf16, blockdiag(W^T, W^T)
        b_k = params["b_pair"]            # (1, 128)   f32
        rows, cin, cout = B // 2, 2 * IN_DIM, 2 * HID_DIM
        max_rows = max(1, block_b // 2)
    else:
        x_k = x
        w_k = params["w_t"]               # (100, 64) bf16
        b_k = params["b"]                 # (1, 64)   f32
        rows, cin, cout = B, IN_DIM, HID_DIM
        max_rows = block_b

    tr = _choose_row_tile(rows, max_rows)
    grid = (pl.cdiv(rows, tr),)

    def _isz(dt):
        return jnp.dtype(dt).itemsize

    cost = pl.CostEstimate(
        flops=2 * rows * cin * cout,
        transcendentals=rows * cout,                        # one exp per sigmoid
        bytes_accessed=(rows * cin * _isz(x_k.dtype)
                        + cin * cout * _isz(w_k.dtype)
                        + cout * _isz(b_k.dtype)
                        + rows * cout * _isz(out_dtype)),
    )

    out = pl.pallas_call(
        _projection_kernel,
        out_shape=jax.ShapeDtypeStruct((rows, cout), out_dtype),
        grid_spec=pl.GridSpec(
            grid=grid,
            in_specs=[
                pl.BlockSpec((tr, cin), lambda i: (i, 0)),      # batch-tiled x
                pl.BlockSpec((cin, cout), lambda i: (0, 0)),    # resident weight
                pl.BlockSpec((1, cout), lambda i: (0, 0)),      # resident bias
            ],
            out_specs=pl.BlockSpec((tr, cout), lambda i: (i, 0)),
        ),
        compiler_params=pltpu.CompilerParams(
            # Batch tiles are independent -> megacore-shardable on v7x (2 TCs);
            # a wash on v5e/v6e (1 TC).
            dimension_semantics=("parallel",),
            # Headroom if block_b is raised; default tiles use only ~9 MiB
            # double-buffered.  32 MiB is safely below physical VMEM everywhere
            # (v5e/v6e 128 MiB, v7x 64 MiB).
            vmem_limit_bytes=32 * 1024 * 1024,
        ),
        cost_estimate=cost,
    )(x_k, w_k, b_k)

    return out.reshape(B, HID_DIM)   # free row-major reshape back to (B, 64)


def init_params(key):
    """Deterministic PyTorch-style init (uniform(-1/sqrt(fan_in), 1/sqrt(fan_in)))."""
    k1, k2, k3, k4 = jax.random.split(key, 4)
    bound_in = 1.0 / jnp.sqrt(jnp.float32(IN_DIM))
    w_in = jax.random.uniform(k1, (HID_DIM, IN_DIM), jnp.float32, -bound_in, bound_in)
    b_in = jax.random.uniform(k2, (HID_DIM,), jnp.float32, -bound_in, bound_in)
    # projection_out params: present in the module but unused in forward.
    bound_out = 1.0 / jnp.sqrt(jnp.float32(HID_DIM))
    w_out = jax.random.uniform(k3, (OUT_DIM, HID_DIM), jnp.float32, -bound_out, bound_out)
    b_out = jax.random.uniform(k4, (OUT_DIM,), jnp.float32, -bound_out, bound_out)
    return w_in, b_in, w_out, b_out


def prepare_params(w_in, b_in):
    """One-time prep OUTSIDE the hot path.

    w_in: (64, 100) torch-layout weight; b_in: (64,) bias.
    Returns:
      w_t    (100, 64)  bf16  plain pre-transposed weight (odd-B fallback)
      b      (1, 64)    f32
      w_pair (200, 128) bf16  blockdiag(W^T, W^T) for the lane-dense even-B path
      b_pair (1, 128)   f32   [b, b]
    """
    w_t = jnp.asarray(w_in, jnp.float32).T.astype(jnp.bfloat16)
    b = jnp.asarray(b_in, jnp.float32).reshape(1, HID_DIM)
    w_pair = jnp.zeros((2 * IN_DIM, 2 * HID_DIM), jnp.bfloat16)
    w_pair = w_pair.at[:IN_DIM, :HID_DIM].set(w_t)
    w_pair = w_pair.at[IN_DIM:, HID_DIM:].set(w_t)
    b_pair = jnp.concatenate([b, b], axis=1)
    return {"w_t": w_t, "b": b, "w_pair": w_pair, "b_pair": b_pair}


if __name__ == "__main__":
    key = jax.random.PRNGKey(0)
    kp, k1, k2, k3, k4 = jax.random.split(key, 5)

    w_in, b_in, w_out, b_out = init_params(kp)
    params = prepare_params(w_in, b_in)

    def ref_fwd(xx):
        return jax.nn.sigmoid(xx.astype(jnp.float32) @ w_in.T + b_in)

    def check(xx, out, tol=2e-2):
        ref = ref_fwd(xx)
        assert out.shape == ref.shape, (out.shape, ref.shape)
        err = float(jnp.max(jnp.abs(out.astype(jnp.float32) - ref)))
        assert err < tol, f"max abs err {err}"

    # --- Small even batch: single tile, lane-dense path, block == full array ---
    B = 8
    x = jax.random.normal(k1, (B, IN_DIM), jnp.float32)
    out = jax.block_until_ready(projection_forward(x, params))
    check(x, out)

    # --- Even batch, multi-tile + remainder (rows=10, tile=8 -> grid=2) ---
    B2 = 20
    x2 = jax.random.normal(k2, (B2, IN_DIM), jnp.float32)
    out2 = jax.block_until_ready(projection_forward(x2, params))
    check(x2, out2)

    # --- Odd batch: narrow (B, 64) fallback path, multi-tile + remainder ---
    B3 = 9
    x3 = jax.random.normal(k3, (B3, IN_DIM), jnp.float32)
    out3 = jax.block_until_ready(projection_forward(x3, params))
    check(x3, out3)

    # --- bf16 input streams straight through (no wrapper cast), f32 output ---
    B4 = 16
    x4 = jax.random.normal(k4, (B4, IN_DIM), jnp.float32).astype(jnp.bfloat16)
    out4 = jax.block_until_ready(
        projection_forward(x4, params, out_dtype=jnp.float32))
    check(x4, out4, tol=3e-2)

    print("KERNEL_OK")
</pallas_src>

<mosaic_0001>
module attributes {stable_mosaic.version = 11 : i64} {
  func.func @_projection_kernel(%arg0: i32, %arg1: memref<4x200xf32, #tpu.memory_space<vmem>>, %arg2: memref<200x128xbf16, #tpu.memory_space<vmem>>, %arg3: memref<1x128xf32, #tpu.memory_space<vmem>>, %arg4: memref<4x128xbf16, #tpu.memory_space<vmem>>) attributes {dimension_semantics = [#tpu.dimension_semantics<parallel>], iteration_bounds = array<i64: 1>, scalar_prefetch = 0 : i64, scratch_operands = 0 : i64, tpu.core_type = #tpu.core_type<tc>, window_params = [{transform_indices = @transform_0, window_bounds = array<i64: 4, 200>}, {pipeline_mode = #tpu.pipeline_mode<synchronous>, transform_indices = @transform_1, window_bounds = array<i64: 200, 128>}, {pipeline_mode = #tpu.pipeline_mode<synchronous>, transform_indices = @transform_2, window_bounds = array<i64: 1, 128>}, {transform_indices = @transform_3, window_bounds = array<i64: 4, 128>}]} {
    %c0 = arith.constant 0 : index
    %c0_0 = arith.constant 0 : index
    %0 = vector.load %arg1[%c0, %c0_0] : memref<4x200xf32, #tpu.memory_space<vmem>>, vector<4x200xf32>
    %1 = arith.truncf %0 : vector<4x200xf32> to vector<4x200xbf16>
    %c0_1 = arith.constant 0 : index
    %c0_2 = arith.constant 0 : index
    %2 = vector.load %arg2[%c0_1, %c0_2] : memref<200x128xbf16, #tpu.memory_space<vmem>>, vector<200x128xbf16>
    %cst = arith.constant dense<0.000000e+00> : vector<4x128xf32>
    %3 = tpu.matmul %1, %2, %cst {dimension_numbers = #tpu.dot_dimension_numbers<[1], [0], [0], [1], [0, 0, 1, 1], [], []>} : vector<4x200xbf16>, vector<200x128xbf16>, vector<4x128xf32> -> vector<4x128xf32>
    %c0_3 = arith.constant 0 : index
    %c0_4 = arith.constant 0 : index
    %4 = vector.load %arg3[%c0_3, %c0_4] : memref<1x128xf32, #tpu.memory_space<vmem>>, vector<1x128xf32>
    %5 = vector.broadcast %4 : vector<1x128xf32> to vector<4x128xf32>
    %6 = arith.addf %3, %5 : vector<4x128xf32>
    %7 = arith.negf %6 : vector<4x128xf32>
    %8 = math.exp %7 : vector<4x128xf32>
    %cst_5 = arith.constant 1.000000e+00 : f32
    %9 = vector.broadcast %cst_5 : f32 to vector<4x128xf32>
    %10 = arith.addf %9, %8 : vector<4x128xf32>
    %11 = arith.divf %9, %10 : vector<4x128xf32>
    %12 = arith.truncf %11 : vector<4x128xf32> to vector<4x128xbf16>
    %c0_6 = arith.constant 0 : index
    %c0_7 = arith.constant 0 : index
    %13 = vector.load %arg4[%c0_6, %c0_7] : memref<4x128xbf16, #tpu.memory_space<vmem>>, vector<4x128xbf16>
    tpu.vector_store %arg4[%c0_6, %c0_7], %12 {strides = array<i32>} : memref<4x128xbf16, #tpu.memory_space<vmem>>, vector<4x128xbf16>,
    return
  }
  func.func @transform_0(%arg0: i32) -> (i32, i32) {
    %c0_i32 = arith.constant 0 : i32
    %c0_i32_0 = arith.constant 0 : i32
    return %arg0, %c0_i32 : i32, i32
  }
  func.func @transform_1(%arg0: i32) -> (i32, i32) {
    %c0_i32 = arith.constant 0 : i32
    %c0_i32_0 = arith.constant 0 : i32
    %c0_i32_1 = arith.constant 0 : i32
    return %c0_i32, %c0_i32_0 : i32, i32
  }
  func.func @transform_2(%arg0: i32) -> (i32, i32) {
    %c0_i32 = arith.constant 0 : i32
    %c0_i32_0 = arith.constant 0 : i32
    %c0_i32_1 = arith.constant 0 : i32
    return %c0_i32, %c0_i32_0 : i32, i32
  }
  func.func @transform_3(%arg0: i32) -> (i32, i32) {
    %c0_i32 = arith.constant 0 : i32
    %c0_i32_0 = arith.constant 0 : i32
    return %arg0, %c0_i32 : i32, i32
  }
}

</mosaic_0001>

<bundles_post_ra>
// kernel: tpu_custom_call.1
= control target key start
LH: loop header
LB: loop body
LE: loop exit
PB: predicated region body
PF: predicated region fallthrough
CT: control target
= control target key end

     0   :  { %8 = vsyncpa [#allocation3], 0  ;;  %s371_s0 = inlined_call_operand.hbm [shape: f32[4,200], index: 0, kind: input, shape index: {}]   ;;  %s372_s1 = inlined_call_operand.hbm [shape: bf16[200,128], index: 1, kind: input, shape index: {}]   ;;  %s373_s2 = inlined_call_operand.vmem [shape: f32[1,128], index: 2, kind: input, shape index: {}]   ;;  %s374_s3 = inlined_call_operand.hbm [shape: bf16[4,128], index: 3, kind: output, shape index: {}]  }
   0x1   :  { %9 = vsyncpa [#allocation6], 0 }
   0x2   :  { %10 = vsyncpa [#allocation4], 0  ;;  %s333_s12 = smov [#allocation2]   ;;  %s334_s14 = smov [#allocation5]  }
   0x3   :  { %s17_s13 = sshll.u32 %s333_s12, 4  ;;  %s26_s15 = sshll.u32 %s334_s14, 4  ;;  %s18_s13 = int_to_ptr.vmem [resolvable:$true] %s17_s13  ;;  %s27_s15 = int_to_ptr.vmem [resolvable:$true] %s26_s15 }
   0x4   :  { %s275_s16 = scalar_lea.vmem %s18_s13, 128  ;;  %p280_p1 = scmp.lt.s32.totalorder %s18_s13, %s18_s13 }
   0x5   :  { %p276_p0 = scmp.ne.s32.totalorder %s18_s13, %s275_s16  ;;  %p281_p2 = scmp.lt.s32.totalorder %s275_s16, %s275_s16 }
   0x7   :  { %p282_p3 = por %p281_p2, %p280_p1 }
   0x9   :  { %p283_p4 = pnand %p282_p3, %p276_p0 }
   0xb   :  { %286 = shalt.err (!%p283_p4)
}
   0xc   :  { %20 = dma.hbm_to_vmem [thread:$0]  %s371_s0, 128, %s18_s13, [#allocation3]  }
   0xd   :  { %s295_s19 = scalar_lea.vmem %s27_s15, 1600  ;;  %p300_p6 = scmp.lt.s32.totalorder %s27_s15, %s27_s15 }
   0xe   :  { %p296_p5 = scmp.ne.s32.totalorder %s27_s15, %s295_s19  ;;  %p301_p7 = scmp.lt.s32.totalorder %s295_s19, %s295_s19 }
  0x10   :  { %p302_p8 = por %p301_p7, %p300_p6 }
  0x12   :  { %p303_p9 = pnand %p302_p8, %p296_p5 }
  0x14   :  { %306 = shalt.err (!%p303_p9)
}
  0x15   :  { %s335_s20 = smov 64   ;;  %s336_s21 = smov 4  }
  0x16   :  { %32 = dma.hbm_to_vmem [thread:$0]  %s372_s1, 1600, %s27_s15, [#allocation6], %s335_s20, %s335_s20, %s336_s21  }
  0x17   :  { %327 = dma.done.wait [#allocation3], 128  }
  0x18   :  { %328 = vsyncadd [#allocation3], 4294967168 }
  0x19   :  { %329 = dma.done.wait [#allocation6], 1600  }
  0x1a   :  { %330 = vsyncadd [#allocation6], 4294965696  ;;  %v337_v0 = vmov 0   ;;  %v249_v1 = vld [vmem:[#allocation5 + $0x38] sm:$0xff]   ;;  %v250_v2 = vld [vmem:[#allocation5 + $0x30] sm:$0xff]   ;;  %vm155_vm0 = vcmask 588800  }
  0x1b   :  { %163 = vmatprep.subr.bf16.mxu0 %v337_v0  ;;  %v251_v3 = vld [vmem:[#allocation5 + $0x28] sm:$0xff]   ;;  %v252_v4 = vld [vmem:[#allocation5 + $0x20] sm:$0xff]   ;;  %v42_v5 = vld [vmem:[#allocation2] sm:$0xff]  ;;  %vm159_vm1 = vcmask 1043456   ;;  %s338_s24 = smov [#allocation7]  }
  0x1c   :  { %164 = vmatpush1.bf16.msra.mxu0 %v249_v1  ;;  %v44_v6 = vcombine.high %v42_v5, %v42_v5  ;;  %v253_v7 = vld [vmem:[#allocation5 + $0x18] sm:$0xff]   ;;  %v254_v9 = vld [vmem:[#allocation5 + $0x10] sm:$0xff]   ;;  %v255_v10 = vld [vmem:[#allocation5 + $0x8] sm:$0xff]   ;;  %v46_v18 = vpack.c.bf16 %v42_v5, %v42_v5  ;;  %s217_s25 = sshll.u32 %s338_s24, 4  ;;  %s218_s25 = int_to_ptr.vmem [resolvable:$true] %s217_s25 }
  0x1d   :  { %165 = vmatprep.subr.bf16.mxu0 %v337_v0  ;;  %v256_v11 = vld [vmem:[#allocation5] sm:$0xff]   ;;  %v258_v14 = vld [vmem:[#allocation5 + $0x58] sm:$0xff]   ;;  %v259_v15 = vld [vmem:[#allocation5 + $0x50] sm:$0xff]   ;;  %s307_s26 = scalar_lea.vmem %s218_s25, 32  ;;  %p312_p11 = scmp.lt.s32.totalorder %s218_s25, %s218_s25 }
  0x1e   :  { %v47_v8 = vpack.c.bf16 %v44_v6, %v44_v6  ;;  %v257_v12 = vld [vmem:[#allocation5 + $0x60] ss:$0 sps:$4 sm:$0xff]   ;;  %v260_v16 = vld [vmem:[#allocation5 + $0x48] sm:$0xff]   ;;  %v227_v19 = vld [vmem:[%s373_s2] ss:$0 sm:$0xff]  ;;  %p308_p10 = scmp.ne.s32.totalorder %s218_s25, %s307_s26  ;;  %p313_p12 = scmp.lt.s32.totalorder %s307_s26, %s307_s26 }
  0x1f   :  { %v161_v13 = vsel %vm159_vm1, %v257_v12, 0  ;;  %v261_v17 = vld [vmem:[#allocation5 + $0x40] sm:$0xff]  }
  0x20   :  { %166 = vmatpush1.bf16.msra.mxu0 %v250_v2  ;;  %241 = vmatprep.mubr.msk.bf16.mxu0 %vm155_vm0, %v47_v8  ;;  %p314_p13 = por %p313_p12, %p312_p11 }
  0x21   :  { %167 = vmatprep.subr.bf16.mxu0 %v337_v0 }
  0x22   :  { %p315_p0 = pnand %p314_p13, %p308_p10 }
  0x24   :  { %168 = vmatpush1.bf16.msra.mxu0 %v251_v3 }
  0x25   :  { %169 = vmatprep.subr.bf16.mxu0 %v337_v0 }
  0x28   :  { %170 = vmatpush1.bf16.msra.mxu0 %v252_v4 }
  0x29   :  { %171 = vmatprep.subr.bf16.mxu0 %v337_v0 }
  0x2c   :  { %172 = vmatpush1.bf16.msra.mxu0 %v253_v7 }
  0x2d   :  { %173 = vmatprep.subr.bf16.mxu0 %v337_v0 }
  0x30   :  { %174 = vmatpush1.bf16.msra.mxu0 %v254_v9 }
  0x31   :  { %175 = vmatprep.subr.bf16.mxu0 %v337_v0 }
  0x34   :  { %176 = vmatpush1.bf16.msra.mxu0 %v255_v10 }
  0x35   :  { %177 = vmatprep.subr.bf16.mxu0 %v337_v0 }
  0x38   :  { %178 = vmatpush1.bf16.msra.mxu0 %v256_v11 }
  0x39   :  { %185 = vmatprep.subr.bf16.mxu0 %v337_v0 }
  0x3c   :  { %186 = vmatpush2.bf16.msra.mxu0 %v161_v13 }
  0x3d   :  { %187 = vmatprep.subr.bf16.mxu0 %v337_v0 }
  0x40   :  { %188 = vmatpush2.bf16.msra.mxu0 %v258_v14 }
  0x41   :  { %189 = vmatprep.subr.bf16.mxu0 %v337_v0 }
  0x44   :  { %190 = vmatpush2.bf16.msra.mxu0 %v259_v15 }
  0x45   :  { %191 = vmatprep.subr.bf16.mxu0 %v337_v0 }
  0x48   :  { %192 = vmatpush2.bf16.msra.mxu0 %v260_v16 }
  0x49   :  { %193 = vmatprep.subr.bf16.mxu0 %v337_v0 }
  0x4c   :  { %194 = vmatpush2.bf16.msra.mxu0 %v261_v17 }
  0x4f   :  { %196 = vmatmul.mubr.bf16.vlgmr.msra.gmra.mxu0 %v46_v18 }
 0x10f   :  { %v197_v20 = vpop.f32.mrf.mxu0 }
 0x110   :  { %v198_v21 = vadd.f32 %v227_v19, %v197_v20 }
 0x111   :  { %v199_v22 = vpop.f32.mrf.mxu0 }
 0x112   :  { %v242_v23 = vmul.f32 -1.442695, %v198_v21 }
 0x113   :  { %v200_v24 = vpop.f32.mrf.mxu0 }
 0x114   :  { %263 = vpow2.f32 %v242_v23 }
 0x115   :  { %v201_v25 = vpop.f32.mrf.mxu0 }
 0x121   :  { %v264_v26 = vpop.eup %263 }
 0x122   :  { %v206_v27 = vadd.f32 1.0, %v264_v26 }
 0x124   :  { %265 = vrcp.f32 %v206_v27 }
 0x131   :  { %v266_v28 = vpop.eup %265 }
 0x132   :  { %v209_v29 = vpack.c.bf16 %v266_v28, %v266_v28 }
 0x134   :  { %210 = vst [vmem:[#allocation7] sm:$0x3] %v209_v29 }
 0x135   :  { %318 = shalt.err (!%p315_p0)
}
 0x136   :  { %220 = dma.vmem_to_hbm [thread:$0]  %s218_s25, 32, %s374_s3, [#allocation4]  }
 0x137   :  { %331 = dma.done.wait [#allocation4], 32  }
 0x138   :  { %332 = vsyncadd [#allocation4], 4294967264 }
 0x139   :  { %224 = vsyncpa [#allocation3], 1 }
 0x13a   :  { %225 = vsyncpa [#allocation6], 1 }
 0x13b   :  { %226 = vsyncpa [#allocation4], 1 }

</bundles_post_ra>
